<compile_context>
chip_gen: v7x
topology: tpu7x:2x2x1
jax: 0.10.0
libtpu: 0.0.40
codegen_flags: <defaults>
</compile_context>

<pallas_src>
import functools

import jax
import jax.numpy as jnp
from jax.experimental import pallas as pl
from jax.experimental.pallas import tpu as pltpu


def _round_up(x, m):
    return (x + m - 1) // m * m


def _pick_tile(dim, cap, align):
    """Largest tile <= cap that divides dim (dim itself if dim <= cap)."""
    if dim <= cap:
        return dim
    t = (cap // align) * align
    while t > align:
        if dim % t == 0:
            return t
        t -= align
    return align


# ---------------------------------------------------------------------------
# Pallas kernel 1: batched tiled matmul (bf16 operands, f32 accumulation),
# optionally with a fused (bias + tanh) epilogue.
# ---------------------------------------------------------------------------
def _bmm_kernel(a_ref, b_ref, o_ref, acc_ref):
    @pl.when(pl.program_id(3) == 0)
    def _():
        acc_ref[...] = jnp.zeros_like(acc_ref)

    acc_ref[...] += jnp.dot(a_ref[...], b_ref[...],
                            preferred_element_type=jnp.float32)

    @pl.when(pl.program_id(3) == pl.num_programs(3) - 1)
    def _():
        o_ref[...] = acc_ref[...]


def _bmm_bias_tanh_kernel(a_ref, b_ref, bias_ref, o_ref, acc_ref):
    @pl.when(pl.program_id(3) == 0)
    def _():
        acc_ref[...] = jnp.zeros_like(acc_ref)

    acc_ref[...] += jnp.dot(a_ref[...], b_ref[...],
                            preferred_element_type=jnp.float32)

    @pl.when(pl.program_id(3) == pl.num_programs(3) - 1)
    def _():
        # bias add (VPU) + tanh (EUP) hide under the MXU-bound matmul.
        o_ref[...] = jnp.tanh(acc_ref[...] + bias_ref[...])


def pallas_bmm(a, b, bias=None, tm_cap=256, tn_cap=256, tk_cap=2048):
    """(G, M, K) @ (G, K, N) -> (G, M, N) float32.

    Operands are cast to bf16 (MXU-native); accumulation stays f32.  If
    `bias` (shape (N,)) is given, the epilogue computes tanh(acc + bias) on
    the lane-dense padded tile.
    """
    G, M, K = a.shape
    Gb, Kb, N = b.shape
    assert G == Gb and K == Kb
    a = a.astype(jnp.bfloat16)
    b = b.astype(jnp.bfloat16)

    Mp, Kp, Np = _round_up(M, 8), _round_up(K, 128), _round_up(N, 128)
    if (Mp, Kp) != (M, K):
        a = jnp.pad(a, ((0, 0), (0, Mp - M), (0, Kp - K)))
    if (Kp, Np) != (K, N):
        b = jnp.pad(b, ((0, 0), (0, Kp - K), (0, Np - N)))

    tm = _pick_tile(Mp, tm_cap, 8)
    tn = _pick_tile(Np, tn_cap, 128)
    tk = _pick_tile(Kp, tk_cap, 128)
    grid = (G, Mp // tm, Np // tn, Kp // tk)

    a_spec = pl.BlockSpec((None, tm, tk), lambda g, i, j, k: (g, i, k))
    b_spec = pl.BlockSpec((None, tk, tn), lambda g, i, j, k: (g, k, j))
    o_spec = pl.BlockSpec((None, tm, tn), lambda g, i, j, k: (g, i, j))

    if bias is None:
        kernel = _bmm_kernel
        in_specs = [a_spec, b_spec]
        operands = (a, b)
    else:
        bias_p = jnp.pad(bias.astype(jnp.float32), (0, Np - N)).reshape(1, Np)
        kernel = _bmm_bias_tanh_kernel
        in_specs = [a_spec, b_spec,
                    pl.BlockSpec((1, tn), lambda g, i, j, k: (0, j))]
        operands = (a, b, bias_p)

    out = pl.pallas_call(
        kernel,
        out_shape=jax.ShapeDtypeStruct((G, Mp, Np), jnp.float32),
        grid_spec=pltpu.PrefetchScalarGridSpec(
            num_scalar_prefetch=0,
            grid=grid,
            in_specs=in_specs,
            out_specs=o_spec,
            scratch_shapes=[pltpu.VMEM((tm, tn), jnp.float32)]),
        compiler_params=pltpu.CompilerParams(
            dimension_semantics=("parallel", "parallel", "parallel",
                                 "arbitrary"),
            vmem_limit_bytes=32 * 1024 * 1024),
    )(*operands)
    if Mp != M or Np != N:
        out = out[:, :M, :N]
    return out


# ---------------------------------------------------------------------------
# Pallas kernel 2: per-channel sum / sum-of-squares (BatchNorm batch stats)
# ---------------------------------------------------------------------------
def _stats_kernel(y_ref, sum_ref, sq_ref):
    @pl.when(pl.program_id(0) == 0)
    def _():
        sum_ref[...] = jnp.zeros_like(sum_ref)
        sq_ref[...] = jnp.zeros_like(sq_ref)

    y = y_ref[...]
    sum_ref[...] += jnp.sum(y, axis=0, keepdims=True)
    sq_ref[...] += jnp.sum(y * y, axis=0, keepdims=True)


def pallas_colstats(y, tm_cap=512):
    M, C = y.shape
    tm = _pick_tile(M, tm_cap, 8)
    s, sq = pl.pallas_call(
        _stats_kernel,
        out_shape=(jax.ShapeDtypeStruct((1, C), jnp.float32),
                   jax.ShapeDtypeStruct((1, C), jnp.float32)),
        grid_spec=pltpu.PrefetchScalarGridSpec(
            num_scalar_prefetch=0,
            grid=(M // tm,),
            in_specs=[pl.BlockSpec((tm, C), lambda i: (i, 0))],
            out_specs=[pl.BlockSpec((1, C), lambda i: (0, 0)),
                       pl.BlockSpec((1, C), lambda i: (0, 0))]),
        compiler_params=pltpu.CompilerParams(
            dimension_semantics=("arbitrary",),
            vmem_limit_bytes=32 * 1024 * 1024),
    )(y)
    return s, sq


# ---------------------------------------------------------------------------
# Pallas kernel 3: fused (x - shift) * scale followed by ReLU
# ---------------------------------------------------------------------------
def _norm_act_kernel(y_ref, shift_ref, scale_ref, o_ref, *, act):
    y = (y_ref[...] - shift_ref[...]) * scale_ref[...]
    if act == "tanh":
        o_ref[...] = jnp.tanh(y)
    else:
        o_ref[...] = jnp.maximum(y, 0.0)


def pallas_norm_act(y, shift, scale, act, tm_cap=512):
    M, C = y.shape
    tm = _pick_tile(M, tm_cap, 8)
    return pl.pallas_call(
        functools.partial(_norm_act_kernel, act=act),
        out_shape=jax.ShapeDtypeStruct((M, C), jnp.float32),
        grid_spec=pltpu.PrefetchScalarGridSpec(
            num_scalar_prefetch=0,
            grid=(M // tm,),
            in_specs=[pl.BlockSpec((tm, C), lambda i: (i, 0)),
                      pl.BlockSpec((1, C), lambda i: (0, 0)),
                      pl.BlockSpec((1, C), lambda i: (0, 0))],
            out_specs=pl.BlockSpec((tm, C), lambda i: (i, 0))),
        compiler_params=pltpu.CompilerParams(
            dimension_semantics=("parallel",),
            vmem_limit_bytes=32 * 1024 * 1024),
    )(y, shift, scale)


def _batchnorm_relu(y2d):
    """BatchNorm2d(affine=False) training-mode batch stats (eps=1e-5) + ReLU
    on a (rows, channels) matrix."""
    M = y2d.shape[0]
    s, sq = pallas_colstats(y2d)
    mean = s / M
    var = jnp.maximum(sq / M - mean * mean, 0.0)   # guard f32 cancellation
    scale = 1.0 / jnp.sqrt(var + 1e-5)
    return pallas_norm_act(y2d, mean, scale, "relu")


# ---------------------------------------------------------------------------
# ConvTranspose2d layers (glue in plain JAX, matmuls in Pallas)
# ---------------------------------------------------------------------------
def proj_layer(x2d, Wt):
    """ConvTranspose2d(100, 1024, k=4, stride=1, padding=0) on a 1x1 input
    == dense matmul: out[b, ky, kx, co] = sum_ci x[b, ci] * W[ci, co, ky, kx].
    Followed by BatchNorm(affine=False) + ReLU."""
    B, CI = x2d.shape
    CO, K = Wt.shape[1], Wt.shape[2]
    # Columns ordered (ky, kx, co) so the result reshapes straight to NHWC.
    Wm = jnp.transpose(Wt, (0, 2, 3, 1)).reshape(CI, K * K * CO)
    Y = pallas_bmm(x2d.astype(jnp.bfloat16)[None],
                   Wm.astype(jnp.bfloat16)[None])[0]        # (B, K*K*CO)
    Y2 = _batchnorm_relu(Y.reshape(B * K * K, CO))
    return Y2.reshape(B, K, K, CO)


def _phase_operands(x, Wt):
    """Sub-pixel decomposition of ConvTranspose2d(k=4, stride=2, padding=1).

    For output parity (py, px), only kernel taps ky = 3 - py - 2*dy,
    kx = 3 - px - 2*dx (dy, dx in {0,1}) hit non-inserted input pixels,
    reading padded input rows/cols (h'+py+dy, w'+px+dx).

    Returns A (4, B*H*W, 4*Cin) and Wm (4, 4*Cin, Cout) in bf16.
    """
    B, H, W_, CI = x.shape
    CO = Wt.shape[1]
    x = x.astype(jnp.bfloat16)
    Wt = Wt.astype(jnp.bfloat16)
    xp = jnp.pad(x, ((0, 0), (1, 1), (1, 1), (0, 0)))
    a_list, w_list = [], []
    for py in range(2):
        for px in range(2):
            patches = [xp[:, py + dy:py + dy + H, px + dx:px + dx + W_, :]
                       for dy in range(2) for dx in range(2)]
            a_list.append(
                jnp.stack(patches, axis=3).reshape(B * H * W_, 4 * CI))
            taps = [Wt[:, :, 3 - py - 2 * dy, 3 - px - 2 * dx]
                    for dy in range(2) for dx in range(2)]
            w_list.append(jnp.stack(taps, axis=0).reshape(4 * CI, CO))
    return jnp.stack(a_list, axis=0), jnp.stack(w_list, axis=0)


def _interleave_phases(yp, B, H, W_, CO):
    """yp: (4, B*H*W, CO) with phase index py*2+px -> (B, 2H, 2W, CO)."""
    y = yp.reshape(2, 2, B, H, W_, CO)
    y = jnp.transpose(y, (2, 3, 0, 4, 1, 5))     # (B, H, py, W, px, CO)
    return y.reshape(B, 2 * H, 2 * W_, CO)


def convt_stride2_layer(x, Wt, bias, bn, act):
    """x: (B, H, W, Cin) NHWC; Wt: (Cin, Cout, 4, 4) PyTorch ConvTranspose2d
    weight with stride=2, padding=1.  Returns (B, 2H, 2W, Cout)."""
    B, H, W_, CI = x.shape
    CO = Wt.shape[1]
    A, Wm = _phase_operands(x, Wt)
    if bn:
        Y = pallas_bmm(A, Wm)                                 # (4, B*H*W, CO)
        Y2 = _batchnorm_relu(Y.reshape(4 * B * H * W_, CO))
        Y = Y2.reshape(4, B * H * W_, CO)
    else:
        # bias + tanh fused into the matmul epilogue (lane-dense 128-wide
        # store, sliced back to the real channel count afterwards).
        Y = pallas_bmm(A, Wm, bias=bias)                      # (4, B*H*W, CO)
    return _interleave_phases(Y, B, H, W_, CO)


# ---------------------------------------------------------------------------
# Generator (matches the PyTorch module structure)
# ---------------------------------------------------------------------------
class GeneratorPallas:
    def __init__(self, size, key):
        self.size = size
        cfgs = [
            # (cin, cout, stride, padding, bn, activation)
            (100, 1024, 1, 0, True, "relu"),    # proj    -> 4x4
            (1024, 512, 2, 1, True, "relu"),    # convT1  -> 8x8
            (512, 256, 2, 1, True, "relu"),     # convT2  -> 16x16
            (256, 128, 2, 1, True, "relu"),     # convT3  -> 32x32
        ]
        if size == [128, 128]:
            cfgs.append((128, 128, 2, 1, True, "relu"))  # convT3_128128
        cfgs.append((128, 3, 2, 1, False, "tanh"))       # convT4 (bias, tanh)
        self.cfgs = cfgs

        params = []
        for (ci, co, _, _, bn, _) in cfgs:
            key, wk, bk = jax.random.split(key, 3)
            W = 0.05 * jax.random.normal(wk, (ci, co, 4, 4), jnp.float32)
            b = (0.05 * jax.random.normal(bk, (co,), jnp.float32)
                 if not bn else None)
            params.append((W, b))
        self.params = params

    def __call__(self, x):
        # PyTorch: x.view(-1, 100, 1, 1); here the 1x1 spatial input collapses
        # to a dense (B, 100) matmul for the projection layer.
        h2 = x.reshape(-1, 100).astype(jnp.float32)
        W0, _ = self.params[0]
        h = proj_layer(h2, W0)
        for (ci, co, s, p, bn, act), (W, b) in zip(self.cfgs[1:],
                                                   self.params[1:]):
            h = convt_stride2_layer(h, W, b, bn, act)
        # Return NCHW like the PyTorch module.
        return jnp.transpose(h, (0, 3, 1, 2))


if __name__ == "__main__":
    key = jax.random.PRNGKey(0)
    pkey, xkey = jax.random.split(key)

    # size=[64,64] path (skips the optional convT3_128128 layer), batch=2.
    gen = GeneratorPallas(size=[64, 64], key=pkey)
    x = jax.random.normal(xkey, (2, 100), jnp.float32)   # latent codes

    out = gen(x)
    out = jax.block_until_ready(out)

    assert out.shape == (2, 3, 64, 64), out.shape
    assert out.dtype == jnp.float32
    assert bool(jnp.all(jnp.isfinite(out)))
    print("KERNEL_OK")
</pallas_src>

<mosaic_0001>
module attributes {stable_mosaic.version = 11 : i64} {
  func.func @_bmm_kernel(%arg0: i32, %arg1: i32, %arg2: i32, %arg3: i32, %arg4: memref<1x8x128xbf16, #tpu.memory_space<vmem>>, %arg5: memref<1x128x256xbf16, #tpu.memory_space<vmem>>, %arg6: memref<1x8x256xf32, #tpu.memory_space<vmem>>, %arg7: memref<8x256xf32, #tpu.memory_space<vmem>>) attributes {dimension_semantics = [#tpu.dimension_semantics<parallel>, #tpu.dimension_semantics<parallel>, #tpu.dimension_semantics<parallel>, #tpu.dimension_semantics<arbitrary>], iteration_bounds = array<i64: 1, 1, 64, 1>, scalar_prefetch = 0 : i64, scratch_operands = 1 : i64, tpu.core_type = #tpu.core_type<tc>, window_params = [{transform_indices = @transform_0, window_bounds = array<i64: 1, 8, 128>}, {transform_indices = @transform_1, window_bounds = array<i64: 1, 128, 256>}, {transform_indices = @transform_2, window_bounds = array<i64: 1, 8, 256>}]} {
    %c0_i32 = arith.constant 0 : i32
    %0 = arith.cmpi eq, %arg3, %c0_i32 : i32
    %1 = arith.extui %0 : i1 to i32
    %c0_i32_0 = arith.constant 0 : i32
    %2 = arith.cmpi ne, %1, %c0_i32_0 : i32
    scf.if %2 {
      %cst_12 = arith.constant 0.000000e+00 : f32
      %14 = vector.broadcast %cst_12 : f32 to vector<8x256xf32>
      %c0_13 = arith.constant 0 : index
      %c0_14 = arith.constant 0 : index
      %15 = vector.load %arg7[%c0_13, %c0_14] : memref<8x256xf32, #tpu.memory_space<vmem>>, vector<8x256xf32>
      tpu.vector_store %arg7[%c0_13, %c0_14], %14 {strides = array<i32>} : memref<8x256xf32, #tpu.memory_space<vmem>>, vector<8x256xf32>,
    } else {
    }
    %c0 = arith.constant 0 : index
    %c0_1 = arith.constant 0 : index
    %3 = vector.load %arg7[%c0, %c0_1] : memref<8x256xf32, #tpu.memory_space<vmem>>, vector<8x256xf32>
    %c0_2 = arith.constant 0 : index
    %c0_3 = arith.constant 0 : index
    %c0_4 = arith.constant 0 : index
    %4 = vector.load %arg4[%c0_2, %c0_3, %c0_4] : memref<1x8x128xbf16, #tpu.memory_space<vmem>>, vector<1x8x128xbf16>
    %5 = vector.shape_cast %4 : vector<1x8x128xbf16> to vector<8x128xbf16>
    %c0_5 = arith.constant 0 : index
    %c0_6 = arith.constant 0 : index
    %c0_7 = arith.constant 0 : index
    %6 = vector.load %arg5[%c0_5, %c0_6, %c0_7] : memref<1x128x256xbf16, #tpu.memory_space<vmem>>, vector<1x128x256xbf16>
    %7 = vector.shape_cast %6 : vector<1x128x256xbf16> to vector<128x256xbf16>
    %cst = arith.constant dense<0.000000e+00> : vector<8x256xf32>
    %8 = tpu.matmul %5, %7, %cst {dimension_numbers = #tpu.dot_dimension_numbers<[1], [0], [0], [1], [0, 0, 1, 1], [], []>} : vector<8x128xbf16>, vector<128x256xbf16>, vector<8x256xf32> -> vector<8x256xf32>
    %9 = arith.addf %3, %8 : vector<8x256xf32>
    %c0_8 = arith.constant 0 : index
    %c0_9 = arith.constant 0 : index
    %10 = vector.load %arg7[%c0_8, %c0_9] : memref<8x256xf32, #tpu.memory_space<vmem>>, vector<8x256xf32>
    tpu.vector_store %arg7[%c0_8, %c0_9], %9 {strides = array<i32>} : memref<8x256xf32, #tpu.memory_space<vmem>>, vector<8x256xf32>,
    %c0_i32_10 = arith.constant 0 : i32
    %11 = arith.cmpi eq, %arg3, %c0_i32_10 : i32
    %12 = arith.extui %11 : i1 to i32
    %c0_i32_11 = arith.constant 0 : i32
    %13 = arith.cmpi ne, %12, %c0_i32_11 : i32
    scf.if %13 {
      %c0_12 = arith.constant 0 : index
      %c0_13 = arith.constant 0 : index
      %14 = vector.load %arg7[%c0_12, %c0_13] : memref<8x256xf32, #tpu.memory_space<vmem>>, vector<8x256xf32>
      %c0_14 = arith.constant 0 : index
      %c0_15 = arith.constant 0 : index
      %c0_16 = arith.constant 0 : index
      %15 = vector.load %arg6[%c0_14, %c0_15, %c0_16] : memref<1x8x256xf32, #tpu.memory_space<vmem>>, vector<1x8x256xf32>
      %16 = vector.shape_cast %15 : vector<1x8x256xf32> to vector<8x256xf32>
      %17 = vector.shape_cast %14 : vector<8x256xf32> to vector<1x8x256xf32>
      tpu.vector_store %arg6[%c0_14, %c0_15, %c0_16], %17 {strides = array<i32>} : memref<1x8x256xf32, #tpu.memory_space<vmem>>, vector<1x8x256xf32>,
    } else {
    }
    return
  }
  func.func @transform_0(%arg0: i32, %arg1: i32, %arg2: i32, %arg3: i32) -> (i32, i32, i32) {
    %c0_i32 = arith.constant 0 : i32
    return %arg0, %arg1, %arg3 : i32, i32, i32
  }
  func.func @transform_1(%arg0: i32, %arg1: i32, %arg2: i32, %arg3: i32) -> (i32, i32, i32) {
    %c0_i32 = arith.constant 0 : i32
    return %arg0, %arg3, %arg2 : i32, i32, i32
  }
  func.func @transform_2(%arg0: i32, %arg1: i32, %arg2: i32, %arg3: i32) -> (i32, i32, i32) {
    %c0_i32 = arith.constant 0 : i32
    return %arg0, %arg1, %arg2 : i32, i32, i32
  }
}

</mosaic_0001>

<bundles_post_ra>
// kernel: tpu_custom_call.1
= control target key start
LH: loop header
LB: loop body
LE: loop exit
PB: predicated region body
PF: predicated region fallthrough
CT: control target
= control target key end

     0   :  { %7 = vsyncpa [#allocation4], 0  ;;  %s1057_s0 = inlined_call_operand.hbm [shape: bf16[1,8,128], index: 0, kind: input, shape index: {}]   ;;  %s1058_s1 = inlined_call_operand.hbm [shape: bf16[1,128,16384], index: 1, kind: input, shape index: {}]   ;;  %s1059_s2 = inlined_call_operand.hbm [shape: f32[1,8,16384], index: 2, kind: output, shape index: {}]  }
   0x1   :  { %8 = vsyncpa [#allocation7], 0 }
   0x2   :  { %10 = vsyncpa [#allocation7 + $0x1], 0 }
   0x3   :  { %11 = vsyncpa [#allocation5], 0 }
   0x4   :  { %13 = vsyncpa [#allocation5 + $0x1], 0  ;;  %s821_s9 = smov 0   ;;  %s823_s10 = smov 0  }
   0x5   :  { %s825_s11 = smov 0   ;;  %s827_s12 = smov 0  }
   0x6   :  { %s829_s13 = smov 0   ;;  %s831_s14 = smov 0  }
   0x7 LB: > { %s517_s15 = sadd.s32 4294967295, %s797_s14   ;;  %s518_s16 = sadd.s32 4294967294, %s797_s14   ;;  %s797_s14 = sphi %s831_s14, %s19_s14   ;;  %s793_s13 = sphi %s829_s13, %s1086_s13   ;;  %s789_s12 = sphi %s827_s12, %s1085_s12   ;;  %s785_s11 = sphi %s825_s11, %s1084_s11   ;;  %s781_s10 = sphi %s823_s10, %s1083_s10   ;;  %s777_s9 = sphi %s821_s9, %s1082_s9  }
   0x8   : > { %s86_s17 = sadd.s32 1, %s785_s11  ;;  %p93_p0 = scmp.ne.s32.totalorder %s785_s11, %s781_s10 }
   0x9   : > { %p94_p1 = scmp.eq.s32.totalorder %s797_s14, 0  ;;  %p99_p2 = scmp.ne.s32.totalorder %s781_s10, %s777_s9 }
   0xa   : > { %p859_p3 = scmp.eq.s32.totalorder %s517_s15, 0  ;;  %p127_p4 = scmp.eq.s32.totalorder %s517_s15, 63 }
   0xb   : > { %p863_p5 = por %p94_p1, %p93_p0  ;;  %p133_p6 = scmp.eq.s32.totalorder %s518_s16, 63 }
   0xc   : > { %s1066_s18 = scalar_select %p859_p3, 1, 0 }
   0xd   : > { %p869_p7 = por %p859_p3, %p99_p2  ;;  %p873_p8 = por %p127_p4, %p93_p0 }
   0xe   : > { %p877_p9 = por %p133_p6, %p99_p2  ;;  %p519_p10 = scmp.ge.s32.totalorder %s797_s14, 1 }
   0xf   : > { %s1068_s20 = scalar_select %p869_p7, 1, 0 }
  0x10   : > { %s1069_s21 = scalar_select %p873_p8, 1, 0 }
  0x11   : > { %s1070_s22 = scalar_select %p877_p9, 1, 0 }
  0x12   : > { %p140_p11 = scmp.lt.s32.totalorder %s797_s14, 65  ;;  %s799_s24 = smov [#allocation3]  }
  0x13   : > { %s157_s25 = sshll.u32 %s799_s24, 4  ;;  %p573_p13 = scmp.lt.s32.totalorder %s797_s14, 64  ;;  %s158_s25 = int_to_ptr.vmem [resolvable:$true] %s157_s25 }
  0x14   : > { %p883_p12 = pnand %p519_p10, %p140_p11  ;;  %s37_s28 = sadd.s32 1, %s793_s13 }
  0x15   : > { %p892_p1 = pnand %p573_p13, %p863_p5  ;;  %p903_p4 = scmp.ge.s32.totalorder %s37_s28, 64 }
  0x16   : > { %s1071_s23 = scalar_select %p883_p12, 1, 0 }
  0x17   : > { %p560_p0 = pneg %p883_p12  ;;  %s168_s30 = sand.u32 1, %s785_s11  }
  0x18   : > { %s1072_s26 = scalar_select %p892_p1, 1, 0 }
  0x19   : > { %p898_p2 = pnand %p560_p0, %p859_p3  ;;  %s653_s5 = scalar_lea.hbm %s1057_s0, 64 }
  0x1a   : > { %s1074_s29 = scalar_select %p903_p4, 1, 0 }
  0x1b   : > { %p654_p5 = scmp.ne.s32.totalorder %s1057_s0, %s653_s5  ;;  %p655_p6 = pneg %p898_p2 }
  0x1c   : > { %p660_p13 = scmp.lt.u32.totalorder %s653_s5, %s1057_s0 }
  0x1d   : > { %p656_p10 = pnand %p655_p6, %p654_p5 }
  0x1f   : > { %p657_p11 = pneg %p656_p10 }
  0x21   : > { %p662_p0 = pnand %p660_p13, %p657_p11 }
  0x23   : > { %665 = shalt.err (!%p662_p0)
}
  0x24   : > { %s666_s16 = scalar_lea.vmem %s158_s25, 64  ;;  %p674_p3 = scmp.lt.s32.totalorder %s158_s25, %s158_s25 }
  0x25   : > { %p667_p9 = scmp.ne.s32.totalorder %s158_s25, %s666_s16  ;;  %p675_p12 = scmp.lt.s32.totalorder %s666_s16, %s666_s16 }
  0x27   : > { %p669_p8 = pnand %p667_p9, %p655_p6  ;;  %p676_p1 = por %p675_p12, %p674_p3 }
  0x29   : > { %p670_p7 = pneg %p669_p8 }
  0x2b   : > { %p677_p4 = pnand %p676_p1, %p670_p7 }
  0x2d   : > { %680 = shalt.err (!%p677_p4)
}
  0x2e   : > { %563 = dma.hbm_to_vmem [thread:$0]  (!%p898_p2), %s1057_s0, 64, %s158_s25, [#allocation4]  }
  0x2f   : > { %p1075_p9 = scmp.ne.s32.totalorder %s1074_s29, 0  ;;  %s522_s3 = sshll.u32 %s168_s30, 7 }
  0x30   : > { %s550_s5 = sshll.u32 %s793_s13, 7  ;;  %s172_s8 = scalar_lea.vmem [#allocation6], %s522_s3 }
  0x31   : > { %s1088_s28 = smov (%p1075_p9, %s37_s28), 0  ;;  %s934_s7 = scalar_lea.hbm %s1058_s1, %s550_s5 }
  0x32   : > { %s82_s4 = ssub.s32 %s793_s13, %s1088_s28  ;;  %s184_s15 = sshll.u32 %s172_s8, 4  ;;  %s941_s15 = int_to_ptr.vmem [resolvable:$true] %s184_s15 }
  0x33   : > { %p84_p3 = scmp.eq.s32.totalorder %s82_s4, 0  ;;  %s943_s29 = scalar_lea.sflag [#allocation7], %s168_s30 }
  0x34   : > { %s681_s16 = scalar_lea.hbm %s934_s7, 2048  ;;  %p1076_p8 = scmp.ne.s32.totalorder %s1072_s26, 0 }
  0x35   : > { %s939_s25 = scalar_select %p84_p3, %s785_s11, %s86_s17  }
  0x36   : > { %p682_p7 = scmp.ne.s32.totalorder %s934_s7, %s681_s16  ;;  %p683_p12 = pneg %p1076_p8 }
  0x37   : > { %s686_s3 = scalar_lea.hbm %s1058_s1, 131072  ;;  %p687_p4 = scmp.lt.u32.totalorder %s934_s7, %s1058_s1 }
  0x38   : > { %p684_p1 = pnand %p683_p12, %p682_p7  ;;  %p688_p5 = scmp.lt.u32.totalorder %s686_s3, %s681_s16 }
  0x39   : > { %p690_p10 = scmp.lt.u32.totalorder %s681_s16, %s934_s7 }
  0x3a   : > { %p685_p2 = pneg %p684_p1  ;;  %p689_p6 = por %p688_p5, %p687_p4 }
  0x3c   : > { %p691_p11 = por %p690_p10, %p689_p6 }
  0x3e   : > { %p692_p13 = pnand %p691_p11, %p685_p2 }
  0x40   : > { %695 = shalt.err (!%p692_p13)
}
  0x41   : > { %s696_s17 = scalar_lea.vmem %s941_s15, 2048  ;;  %s800_s30 = smov [#allocation6]  }
  0x42   : > { %p697_p0 = scmp.ne.s32.totalorder %s941_s15, %s696_s17  ;;  %s701_s27 = sshll.u32 %s800_s30, 4  ;;  %s702_s27 = int_to_ptr.vmem [resolvable:$false] %s701_s27 }
  0x43   : > { %s703_s6 = scalar_lea.vmem %s702_s27, 4096  ;;  %p704_p7 = scmp.lt.s32.totalorder %s941_s15, %s702_s27 }
  0x44   : > { %p699_p9 = pnand %p697_p0, %p683_p12  ;;  %p705_p1 = scmp.lt.s32.totalorder %s703_s6, %s696_s17 }
  0x46   : > { %p700_p3 = pneg %p699_p9  ;;  %p706_p4 = por %p705_p1, %p704_p7 }
  0x48   : > { %p707_p5 = pnand %p706_p4, %p700_p3 }
  0x4a   : > { %710 = shalt.err (!%p707_p5)
}
  0x4b   : > { %s801_s8 = smov 8192   ;;  %s802_s16 = smov 128  }
  0x4c   : > { %s803_s19 = smov 8   ;;  %p1077_p12 = scmp.ne.s32.totalorder %s1071_s23, 0 }
  0x4d   : > { %567 = dma.hbm_to_vmem [thread:$0]  (!%p1076_p8), %s934_s7, 2048, %s941_s15, %s943_s29, %s801_s8, %s802_s16, %s803_s19  }
  0x4e   : > { %196 = sbr.rel (%p1077_p12) target bundleno = 351 (0x15f), region = 28  ;;  %p1078_p2 = scmp.ne.s32.totalorder (!%p1077_p12), %s1066_s18, 0 }
  0x55   : > { %764 = dma.done.wait (%p1078_p2), [#allocation4], 64  }
  0x56   : > { %766 = vsyncadd (%p1078_p2), [#allocation4], 4294967232  ;;  %s978_s24 = sand.u32 1, %s781_s10   ;;  %p1079_p8 = scmp.ne.s32.totalorder %s1068_s20, 0 }
  0x57   : > { %s527_s3 = sshll.u32 %s978_s24, 7  ;;  %s203_s4 = scalar_lea.sflag [#allocation7], %s978_s24 }
  0x58   : > { %s982_s5 = scalar_lea.vmem [#allocation6], %s527_s3 }
  0x59   : > { %768 = dma.done.wait (%p1079_p8), %s203_s4, 2048  }
  0x5a   : > { %770 = vsyncadd (%p1079_p8), %s203_s4, 4294965248  ;;  %v804_v0 = vmov 0   ;;  %v629_v1 = vld [vmem:[%s982_s5 + $0x4] ss:$8 sps:$4 sm:$0xff]   ;;  %v631_v2 = vld [vmem:[%s982_s5] ss:$8 sps:$4 sm:$0xff]  }
  0x5b   : > { %368 = vmatprep.mubr.bf16.mxu0 %v804_v0  ;;  %336 = vmatprep.subr.bf16.mxu0 %v629_v1  ;;  %v632_v3 = vld [vmem:[%s982_s5 + $0x14] ss:$8 sps:$4 sm:$0xff]   ;;  %v634_v4 = vld [vmem:[%s982_s5 + $0x10] ss:$8 sps:$4 sm:$0xff]   ;;  %v635_v5 = vld [vmem:[%s982_s5 + $0x24] ss:$8 sps:$4 sm:$0xff]  }
  0x5c   : > { %337 = vmatpush1.bf16.msra.mxu0 %v631_v2  ;;  %v637_v6 = vld [vmem:[%s982_s5 + $0x20] ss:$8 sps:$4 sm:$0xff]   ;;  %v638_v7 = vld [vmem:[%s982_s5 + $0x34] ss:$8 sps:$4 sm:$0xff]   ;;  %v640_v8 = vld [vmem:[%s982_s5 + $0x30] ss:$8 sps:$4 sm:$0xff]  }
  0x5d   : > { %338 = vmatprep.subr.bf16.mxu0 %v632_v3  ;;  %v641_v9 = vld [vmem:[%s982_s5 + $0x44] ss:$8 sps:$4 sm:$0xff]   ;;  %v643_v10 = vld [vmem:[%s982_s5 + $0x40] ss:$8 sps:$4 sm:$0xff]   ;;  %v644_v11 = vld [vmem:[%s982_s5 + $0x54] ss:$8 sps:$4 sm:$0xff]  }
  0x5e   : > { %v646_v12 = vld [vmem:[%s982_s5 + $0x50] ss:$8 sps:$4 sm:$0xff]   ;;  %v647_v13 = vld [vmem:[%s982_s5 + $0x64] ss:$8 sps:$4 sm:$0xff]   ;;  %v649_v14 = vld [vmem:[%s982_s5 + $0x60] ss:$8 sps:$4 sm:$0xff]  }
  0x5f   : > { %v650_v15 = vld [vmem:[%s982_s5 + $0x74] ss:$8 sps:$4 sm:$0xff]   ;;  %v652_v16 = vld [vmem:[%s982_s5 + $0x70] ss:$8 sps:$4 sm:$0xff]   ;;  %s528_s18 = sshll.u32 %s978_s24, 4  ;;  %s551_s26 = sshll.u32 %s789_s12, 8 }
  0x60   : > { %339 = vmatpush1.bf16.msra.mxu0 %v634_v4  ;;  %v239_v17 = vld [vmem:[#allocation3] sm:$0xf]  ;;  %s226_s20 = scalar_lea.vmem [#allocation8], %s528_s18  ;;  %s1011_s29 = scalar_lea.hbm %s1059_s2, %s551_s26 }
  0x61   : > { %340 = vmatprep.subr.bf16.mxu0 %v635_v5  ;;  %s407_s23 = sshll.u32 %s226_s20, 4  ;;  %s389_s17 = scalar_lea.sflag [#allocation5], %s978_s24  ;;  %s1006_s23 = int_to_ptr.vmem [resolvable:$true] %s407_s23 }
  0x62   : > { %s711_s30 = scalar_lea.vmem %s1006_s23, 256  ;;  %p1080_p10 = scmp.ne.s32.totalorder %s1069_s21, 0 }
  0x63   : > { %p712_p6 = scmp.ne.s32.totalorder %s1006_s23, %s711_s30  ;;  %s805_s12 = smov [#allocation8]  }
  0x64   : > { %341 = vmatpush1.bf16.msra.mxu0 %v637_v6  ;;  %s715_s27 = sshll.u32 %s805_s12, 4  ;;  %s716_s27 = int_to_ptr.vmem [resolvable:$false] %s715_s27 }
  0x65   : > { %342 = vmatprep.subr.bf16.mxu0 %v638_v7  ;;  %p713_p11 = pnand %p712_p6, %p1080_p10  ;;  %s717_s6 = scalar_lea.vmem %s716_s27, 512 }
  0x66   : > { %p718_p0 = scmp.lt.s32.totalorder %s1006_s23, %s716_s27  ;;  %p719_p9 = scmp.lt.s32.totalorder %s717_s6, %s711_s30 }
  0x67   : > { %p714_p13 = pneg %p713_p11 }
  0x68   : > { %343 = vmatpush1.bf16.msra.mxu0 %v640_v8  ;;  %p720_p3 = por %p719_p9, %p718_p0 }
  0x69   : > { %344 = vmatprep.subr.bf16.mxu0 %v641_v9 }
  0x6a   : > { %p721_p7 = pnand %p720_p3, %p714_p13 }
  0x6c   : > { %345 = vmatpush1.bf16.msra.mxu0 %v643_v10 }
  0x6d   : > { %346 = vmatprep.subr.bf16.mxu0 %v644_v11 }
  0x70   : > { %347 = vmatpush1.bf16.msra.mxu0 %v646_v12 }
  0x71   : > { %348 = vmatprep.subr.bf16.mxu0 %v647_v13 }
  0x74   : > { %349 = vmatpush1.bf16.msra.mxu0 %v649_v14 }
  0x75   : > { %350 = vmatprep.subr.bf16.mxu0 %v650_v15 }
  0x78   : > { %351 = vmatpush1.bf16.msra.mxu0 %v652_v16 }
  0x7b   : > { %369 = vmatmul.mubr.bf16.vlgmr.msra.gmra.mrb[0].mxu0 %v239_v17 }
 0x14e   : > { %v370_v18 = vpop.f32.mrb[0].mxu0 }
 0x14f   : > { %386 = vst [vmem:[%s226_s20] sm:$0xff] %v370_v18  ;;  %v372_v19 = vpop.f32.mrb[1].mxu0 }
 0x150   : > { %387 = vst [vmem:[%s226_s20 + $0x8] sm:$0xff] %v372_v19  ;;  %v374_v20 = vpop.f32.mrb[2].mxu0 }
 0x151   : > { %v375_v21 = vpop.f32.mrb[3].mxu0 }
 0x152   : > { %724 = shalt.err (!%p721_p7)
}
 0x153   : > { %s725_s8 = scalar_lea.hbm %s1011_s29, 256  ;;  %s729_s24 = scalar_lea.hbm %s1059_s2, 16384 }
 0x154   : > { %p726_p1 = scmp.ne.s32.totalorder %s1011_s29, %s725_s8  ;;  %p730_p12 = scmp.lt.u32.totalorder %s1011_s29, %s1059_s2 }
 0x155   : > { %p731_p2 = scmp.lt.u32.totalorder %s729_s24, %s725_s8  ;;  %p733_p6 = scmp.lt.u32.totalorder %s725_s8, %s1011_s29 }
 0x156   : > { %p727_p4 = pnand %p726_p1, %p1080_p10 }
 0x157   : > { %p732_p8 = por %p731_p2, %p730_p12 }
 0x158   : > { %p728_p5 = pneg %p727_p4 }
 0x159   : > { %p734_p11 = por %p733_p6, %p732_p8 }
 0x15b   : > { %p735_p13 = pnand %p734_p11, %p728_p5 }
 0x15d   : > { %738 = shalt.err (!%p735_p13)
}
 0x15e   : > { %558 = dma.vmem_to_hbm [thread:$0]  (%p1080_p10), %s1006_s23, 256, %s1011_s29, %s389_s17  }
 0x15f PF: > { %p575_p0 = scmp.ge.s32.totalorder %s797_s14, 2  ;;  %s419_s5 = sand.u32 1, %s777_s9  }
 0x160   : > { %p1081_p9 = scmp.ne.s32.totalorder %s1070_s22, 0  ;;  %s420_s18 = scalar_lea.sflag [#allocation5], %s419_s5 }
 0x162   : > { %p569_p3 = pnand %p575_p0, %p1081_p9 }
 0x164   : > { %772 = dma.done.wait (!%p569_p3), %s420_s18, 256  }
 0x165   : > { %774 = vsyncadd (!%p569_p3), %s420_s18, 4294967040  ;;  %s19_s14 = sadd.s32 1, %s797_s14   ;;  %s1082_s9 = smov %s781_s10 }
 0x166   : > { %p16_p7 = scmp.ge.s32.totalorder %s19_s14, 66   ;;  %s1083_s10 = smov %s785_s11 }
 0x167   : > { %s1084_s11 = smov %s939_s25  ;;  %s1085_s12 = smov %s793_s13 }
 0x168   : > { %s1086_s13 = smov %s1088_s28  ;;  %18 = sbr.rel (!%p16_p7) target bundleno = 7 (0x7), region = 87 }
 0x16f   :  { %425 = vsyncpa [#allocation4], 1 }
 0x170   :  { %427 = vsyncpa [#allocation4 + $0x1], 1 }
 0x171   :  { %428 = vsyncpa [#allocation7], 1 }
 0x172   :  { %430 = vsyncpa [#allocation7 + $0x1], 1 }
 0x173   :  { %431 = vsyncpa [#allocation5], 1 }
 0x174   :  { %433 = vsyncpa [#allocation5 + $0x1], 1 }

</bundles_post_ra>
